<compile_context>
chip_gen: v7x
topology: tpu7x:2x2x1
jax: 0.10.0
libtpu: 0.0.40
codegen_flags: <defaults>
</compile_context>

<pallas_src>
import functools

import jax
import jax.numpy as jnp
from jax.experimental import pallas as pl
from jax.experimental.pallas import tpu as pltpu

_LANES = 128          # vreg lane count (last-dim tiling unit)
_SUBLANES = 8         # vreg sublane count (second-minor tiling unit)
# Conservative per-step working-set budget: fits v5e's 16 MiB scoped-VMEM
# default and v7x's 64 MiB physical VMEM with headroom (v6e has 128 MiB).
_VMEM_BUDGET_BYTES = 10 * 1024 * 1024
_MAX_TILE_LANES = 8192
_MAX_TILE_ROWS = 8192
# Above this table size the one-hot MXU gather stops paying off vs streaming
# pre-gathered rows from HBM -> use the streamed fallback instead.
_MAX_FUSED_TABLE_ROWS = 512


def _round_up(x, m):
    return ((x + m - 1) // m) * m


def _pick_tile(n, bytes_per_unit, budget_bytes, cap, align):
    """Largest `align`-aligned tile whose per-step working set fits the VMEM
    budget, then rebalanced so the (parallel) grid axis has >= 2 near-equal
    steps whenever possible (keeps both v7x TensorCores busy)."""
    n_pad = _round_up(max(n, 1), align)
    tile = max(align, min(cap, budget_bytes // max(bytes_per_unit, 1)))
    tile = (tile // align) * align
    tile = min(tile, n_pad)
    steps = pl.cdiv(n_pad, tile)
    if steps == 1 and n_pad > align:
        steps = 2                       # split one giant block across two TCs
    elif steps > 2 and steps % 2:
        steps += 1                      # even, balanced step count
    return min(n_pad, _round_up(pl.cdiv(n_pad, steps), align))


# ---------------------------------------------------------------------------
# Fused path: gather + bias + dot inside the kernel (small embedding tables).
# ---------------------------------------------------------------------------

def _mf_fused_kernel(ut_ref, it_ref, uidx_ref, iidx_ref, out_ref, *, use_logit):
    """Lane-dense fused gather + factor dot.

    ut_ref: (Fp, Up) f32, user table^T, rows = [emb; bias; 1; 0-pad] (resident)
    it_ref: (Fp, Ip) f32, item table^T, rows = [emb; 1; bias; 0-pad] (resident)
    uidx_ref / iidx_ref: (1, T) int32 indices for this tile
    out_ref: (1, T) f32 predictions
    """
    up = ut_ref.shape[1]
    ip = it_ref.shape[1]
    t = out_ref.shape[1]
    u_onehot = (jax.lax.broadcasted_iota(jnp.int32, (up, t), 0)
                == uidx_ref[...]).astype(jnp.float32)          # (Up, T)
    i_onehot = (jax.lax.broadcasted_iota(jnp.int32, (ip, t), 0)
                == iidx_ref[...]).astype(jnp.float32)          # (Ip, T)
    # MXU is used only as an exact row-gather (one-hot columns, HIGHEST
    # precision -> full f32); the factor dot stays on the VPU + XLU below.
    ue = jnp.dot(ut_ref[...], u_onehot,
                 preferred_element_type=jnp.float32,
                 precision=jax.lax.Precision.HIGHEST)          # (Fp, T)
    ui = jnp.dot(it_ref[...], i_onehot,
                 preferred_element_type=jnp.float32,
                 precision=jax.lax.Precision.HIGHEST)          # (Fp, T)
    # Bias rows are baked into the tables, so the whole prediction is one
    # VPU multiply + XLU sublane reduce onto lane-dense (1, T) output.
    preds = jnp.sum(ue * ui, axis=0, keepdims=True)            # (1, T)
    if use_logit:
        preds = jax.nn.sigmoid(preds)
    out_ref[...] = preds


def _mf_pallas_fused(ut, it, u_idx, i_idx, use_logit):
    """ut/it: (Fp, Up)/(Fp, Ip) f32; u_idx/i_idx: (1, N) int32 -> (1, N) f32."""
    fp, up = ut.shape
    ip = it.shape[1]
    n = u_idx.shape[1]
    # Per-lane VMEM: one-hots + iotas + gathered columns + product + the
    # double-buffered idx/out IO blocks (rough, intentionally generous).
    bytes_per_lane = 4 * (2 * (up + ip) + 4 * fp) + 2 * 3 * 4
    tile = _pick_tile(n, bytes_per_lane, _VMEM_BUDGET_BYTES, _MAX_TILE_LANES,
                      _LANES)
    grid = (pl.cdiv(n, tile),)
    return pl.pallas_call(
        functools.partial(_mf_fused_kernel, use_logit=use_logit),
        out_shape=jax.ShapeDtypeStruct((1, n), jnp.float32),
        grid_spec=pltpu.PrefetchScalarGridSpec(
            num_scalar_prefetch=0,
            grid=grid,
            in_specs=[
                # Constant index_map: the small tables are DMA'd once and stay
                # resident in VMEM across every grid step.
                pl.BlockSpec((fp, up), lambda i: (0, 0)),
                pl.BlockSpec((fp, ip), lambda i: (0, 0)),
                pl.BlockSpec((1, tile), lambda i: (0, i)),
                pl.BlockSpec((1, tile), lambda i: (0, i)),
            ],
            out_specs=pl.BlockSpec((1, tile), lambda i: (0, i)),
        ),
        compiler_params=pltpu.CompilerParams(
            dimension_semantics=("parallel",)),
    )(ut, it, u_idx, i_idx)


def _augmented_tables(params):
    """Transposed, bias-augmented tables: user rows [emb; bias; 1], item rows
    [emb; 1; bias], zero-padded to (8,128)-aligned (Fp, Rp) f32 slabs so the
    in-kernel one-hot gather hits MXU-friendly shapes.  The prediction is then
    simply the sum over rows of (user_col * item_col)."""
    ue = params["user_embeddings"].astype(jnp.float32)
    ub = params["user_biases"].astype(jnp.float32)
    ie = params["item_embeddings"].astype(jnp.float32)
    ib = params["item_biases"].astype(jnp.float32)
    n_users, f = ue.shape
    n_items = ie.shape[0]
    ut = jnp.concatenate([ue, ub, jnp.ones((n_users, 1), jnp.float32)], 1).T
    it = jnp.concatenate([ie, jnp.ones((n_items, 1), jnp.float32), ib], 1).T
    fp = _round_up(f + 2, _SUBLANES)
    up = _round_up(n_users, _LANES)
    ip = _round_up(n_items, _LANES)
    ut = jnp.pad(ut, ((0, fp - (f + 2)), (0, up - n_users)))
    it = jnp.pad(it, ((0, fp - (f + 2)), (0, ip - n_items)))
    return ut, it


# ---------------------------------------------------------------------------
# Streamed fallback: very large tables, rows gathered in the wrapper.
# ---------------------------------------------------------------------------

def _mf_streamed_kernel(ue_ref, ui_ref, bias_ref, out_ref, *, use_logit):
    # ue_ref/ui_ref: (T, F); bias_ref/out_ref: (T, 1)
    preds = bias_ref[...] + jnp.sum(ue_ref[...] * ui_ref[...], axis=-1,
                                    keepdims=True)
    if use_logit:
        preds = jax.nn.sigmoid(preds)
    out_ref[...] = preds


def _mf_pallas_streamed(ues, uis, bias, use_logit):
    """ues/uis: (N, F) f32; bias: (N, 1) f32 -> preds (N, 1) f32.

    TODO(synk): lane-dense output + in-kernel DMA gather (pl.ANY tables with
    scalar-prefetched row indices) would remove the extra HBM round trip of
    the gathered (N, F) intermediates for huge tables as well.
    """
    n, f = ues.shape
    # Double-buffered per-row working set: two F-wide f32 streams + bias + out.
    bytes_per_row = 2 * (2 * f + 2) * 4
    tile = _pick_tile(n, bytes_per_row, _VMEM_BUDGET_BYTES, _MAX_TILE_ROWS,
                      _SUBLANES)
    grid = (pl.cdiv(n, tile),)
    return pl.pallas_call(
        functools.partial(_mf_streamed_kernel, use_logit=use_logit),
        out_shape=jax.ShapeDtypeStruct((n, 1), jnp.float32),
        grid_spec=pltpu.PrefetchScalarGridSpec(
            num_scalar_prefetch=0,
            grid=grid,
            in_specs=[
                pl.BlockSpec((tile, f), lambda i: (i, 0)),
                pl.BlockSpec((tile, f), lambda i: (i, 0)),
                pl.BlockSpec((tile, 1), lambda i: (i, 0)),
            ],
            out_specs=pl.BlockSpec((tile, 1), lambda i: (i, 0)),
        ),
        compiler_params=pltpu.CompilerParams(
            dimension_semantics=("parallel",)),
    )(ues, uis, bias)


# ---------------------------------------------------------------------------
# Public wrapper mirroring MatrixFactorization.forward.
# ---------------------------------------------------------------------------

def init_params(key, n_users, n_items, n_factors):
    """Deterministic synthetic parameters matching nn.Embedding shapes."""
    k1, k2, k3, k4 = jax.random.split(key, 4)
    return {
        "user_biases": jax.random.normal(k1, (n_users, 1), jnp.float32),
        "item_biases": jax.random.normal(k2, (n_items, 1), jnp.float32),
        "user_embeddings": jax.random.normal(k3, (n_users, n_factors),
                                             jnp.float32),
        "item_embeddings": jax.random.normal(k4, (n_items, n_factors),
                                             jnp.float32),
    }


def mf_forward(params, users, items, use_logit=False, force_streamed=False):
    """Mirrors MatrixFactorization.forward for users (B,), items (B,) or (B, M).

    dropout_p == 0 in the reference module -> nn.Dropout is the identity.
    """
    users = jnp.asarray(users, jnp.int32)
    items = jnp.asarray(items, jnp.int32)
    n_users = params["user_embeddings"].shape[0]
    n_items = params["item_embeddings"].shape[0]

    if items.ndim == 2:                          # (B, M) item lists
        b, m = items.shape
        u_flat = jnp.repeat(users, m)            # indices only: 4 bytes/elem,
        i_flat = items.reshape(-1)               # no (B*M, F) user broadcast.
        out_3d = (b, m, 1)
    else:
        u_flat, i_flat, out_3d = users, items, None
    n = i_flat.shape[0]

    fuse = (not force_streamed
            and n_users <= _MAX_FUSED_TABLE_ROWS
            and n_items <= _MAX_FUSED_TABLE_ROWS)
    if fuse:
        ut, it = _augmented_tables(params)
        preds = _mf_pallas_fused(ut, it, u_flat.reshape(1, n),
                                 i_flat.reshape(1, n), use_logit)   # (1, N)
        preds = preds.reshape(n, 1)              # contiguous reshape -> free
    else:
        # TODO(synk): for huge tables, fuse this gather into the kernel with a
        # manual DMA gather instead of materializing (N, F) rows in HBM.
        ues = params["user_embeddings"][u_flat].astype(jnp.float32)
        uis = params["item_embeddings"][i_flat].astype(jnp.float32)
        bias = (params["user_biases"][u_flat]
                + params["item_biases"][i_flat]).astype(jnp.float32)
        preds = _mf_pallas_streamed(ues, uis, bias, use_logit)       # (N, 1)

    if out_3d is not None:
        preds = preds.reshape(out_3d)
    return preds


def _mf_reference(params, users, items, use_logit=False):
    ues = params["user_embeddings"][users]
    uis = params["item_embeddings"][items]
    b_user = params["user_biases"][users].reshape(-1, 1)
    b_item = params["item_biases"][items]
    if uis.ndim == 3:
        b_user = b_user[:, :, None]
        ues = ues[:, None, :]
    preds = b_user + b_item + jnp.sum(ues * uis, axis=-1, keepdims=True)
    if use_logit:
        preds = jax.nn.sigmoid(preds)
    return preds


if __name__ == "__main__":
    n_users, n_items, n_factors = 50, 60, 40
    key = jax.random.PRNGKey(0)
    kp, ku, ki, ku2, ki2, ku3, ki3 = jax.random.split(key, 7)

    params = init_params(kp, n_users, n_items, n_factors)

    # Case 1: one item per user, ragged batch (13 not a multiple of 8/128).
    users = jax.random.randint(ku, (13,), 0, n_users)
    items_1d = jax.random.randint(ki, (13,), 0, n_items)
    preds_1d = jax.block_until_ready(mf_forward(params, users, items_1d))
    ref_1d = _mf_reference(params, users, items_1d)
    assert preds_1d.shape == (13, 1)
    assert jnp.allclose(preds_1d, ref_1d, atol=1e-4, rtol=1e-5)

    # Case 1b: use_logit branch.
    preds_sig = jax.block_until_ready(
        mf_forward(params, users, items_1d, use_logit=True))
    ref_sig = _mf_reference(params, users, items_1d, use_logit=True)
    assert jnp.allclose(preds_sig, ref_sig, atol=1e-4, rtol=1e-5)

    # Case 2: M items per user -> preds (B, M, 1) (the uis.ndim == 3 branch,
    # ragged M = 10).
    users_b = jax.random.randint(ku2, (4,), 0, n_users)
    items_2d = jax.random.randint(ki2, (4, 10), 0, n_items)
    preds_2d = jax.block_until_ready(mf_forward(params, users_b, items_2d))
    ref_2d = _mf_reference(params, users_b, items_2d)
    assert preds_2d.shape == (4, 10, 1)
    assert jnp.allclose(preds_2d, ref_2d, atol=1e-4, rtol=1e-5)

    # Case 3: larger batch -> multiple balanced (parallel) grid steps.
    users_l = jax.random.randint(ku3, (2500,), 0, n_users)
    items_l = jax.random.randint(ki3, (2500,), 0, n_items)
    preds_l = jax.block_until_ready(mf_forward(params, users_l, items_l))
    ref_l = _mf_reference(params, users_l, items_l)
    assert preds_l.shape == (2500, 1)
    assert jnp.allclose(preds_l, ref_l, atol=1e-4, rtol=1e-5)

    # Case 4: exercise the large-table (streamed) fallback kernel as well.
    preds_s = jax.block_until_ready(
        mf_forward(params, users_l, items_l, force_streamed=True))
    assert jnp.allclose(preds_s, ref_l, atol=1e-4, rtol=1e-5)

    print("KERNEL_OK")
</pallas_src>

<mosaic_0001>
module attributes {stable_mosaic.version = 11 : i64} {
  func.func @_mf_fused_kernel(%arg0: i32, %arg1: memref<48x128xf32, #tpu.memory_space<vmem>>, %arg2: memref<48x128xf32, #tpu.memory_space<vmem>>, %arg3: memref<1x128xi32, #tpu.memory_space<vmem>>, %arg4: memref<1x128xi32, #tpu.memory_space<vmem>>, %arg5: memref<1x128xf32, #tpu.memory_space<vmem>>) attributes {dimension_semantics = [#tpu.dimension_semantics<parallel>], iteration_bounds = array<i64: 1>, scalar_prefetch = 0 : i64, scratch_operands = 0 : i64, tpu.core_type = #tpu.core_type<tc>, window_params = [{pipeline_mode = #tpu.pipeline_mode<synchronous>, transform_indices = @transform_0, window_bounds = array<i64: 48, 128>}, {pipeline_mode = #tpu.pipeline_mode<synchronous>, transform_indices = @transform_1, window_bounds = array<i64: 48, 128>}, {transform_indices = @transform_2, window_bounds = array<i64: 1, 128>}, {transform_indices = @transform_3, window_bounds = array<i64: 1, 128>}, {transform_indices = @transform_4, window_bounds = array<i64: 1, 128>}]} {
    %0 = tpu.iota {dimensions = array<i32: 0>} : vector<128x128xi32>
    %c0 = arith.constant 0 : index
    %c0_0 = arith.constant 0 : index
    %1 = vector.load %arg3[%c0, %c0_0] : memref<1x128xi32, #tpu.memory_space<vmem>>, vector<1x128xi32>
    %2 = vector.broadcast %1 : vector<1x128xi32> to vector<128x128xi32>
    %3 = arith.cmpi eq, %0, %2 : vector<128x128xi32>
    %4 = arith.extui %3 : vector<128x128xi1> to vector<128x128xi32>
    %5 = arith.sitofp %4 : vector<128x128xi32> to vector<128x128xf32>
    %6 = tpu.iota {dimensions = array<i32: 0>} : vector<128x128xi32>
    %c0_1 = arith.constant 0 : index
    %c0_2 = arith.constant 0 : index
    %7 = vector.load %arg4[%c0_1, %c0_2] : memref<1x128xi32, #tpu.memory_space<vmem>>, vector<1x128xi32>
    %8 = vector.broadcast %7 : vector<1x128xi32> to vector<128x128xi32>
    %9 = arith.cmpi eq, %6, %8 : vector<128x128xi32>
    %10 = arith.extui %9 : vector<128x128xi1> to vector<128x128xi32>
    %11 = arith.sitofp %10 : vector<128x128xi32> to vector<128x128xf32>
    %c0_3 = arith.constant 0 : index
    %c0_4 = arith.constant 0 : index
    %12 = vector.load %arg1[%c0_3, %c0_4] : memref<48x128xf32, #tpu.memory_space<vmem>>, vector<48x128xf32>
    %cst = arith.constant dense<0.000000e+00> : vector<48x128xf32>
    %13 = tpu.matmul %12, %5, %cst {dimension_numbers = #tpu.dot_dimension_numbers<[1], [0], [0], [1], [0, 0, 1, 1], [], []>, precision = #tpu.contract_precision<fp32>} : vector<48x128xf32>, vector<128x128xf32>, vector<48x128xf32> -> vector<48x128xf32>
    %c0_5 = arith.constant 0 : index
    %c0_6 = arith.constant 0 : index
    %14 = vector.load %arg2[%c0_5, %c0_6] : memref<48x128xf32, #tpu.memory_space<vmem>>, vector<48x128xf32>
    %cst_7 = arith.constant dense<0.000000e+00> : vector<48x128xf32>
    %15 = tpu.matmul %14, %11, %cst_7 {dimension_numbers = #tpu.dot_dimension_numbers<[1], [0], [0], [1], [0, 0, 1, 1], [], []>, precision = #tpu.contract_precision<fp32>} : vector<48x128xf32>, vector<128x128xf32>, vector<48x128xf32> -> vector<48x128xf32>
    %16 = arith.mulf %13, %15 : vector<48x128xf32>
    %cst_8 = arith.constant dense<0.000000e+00> : vector<128xf32>
    %17 = vector.multi_reduction <add>, %16, %cst_8 [0] : vector<48x128xf32> to vector<128xf32>
    %18 = vector.shape_cast %17 : vector<128xf32> to vector<1x128xf32>
    %c0_9 = arith.constant 0 : index
    %c0_10 = arith.constant 0 : index
    %19 = vector.load %arg5[%c0_9, %c0_10] : memref<1x128xf32, #tpu.memory_space<vmem>>, vector<1x128xf32>
    tpu.vector_store %arg5[%c0_9, %c0_10], %18 {strides = array<i32>} : memref<1x128xf32, #tpu.memory_space<vmem>>, vector<1x128xf32>,
    return
  }
  func.func @transform_0(%arg0: i32) -> (i32, i32) {
    %c0_i32 = arith.constant 0 : i32
    %c0_i32_0 = arith.constant 0 : i32
    %c0_i32_1 = arith.constant 0 : i32
    return %c0_i32, %c0_i32_0 : i32, i32
  }
  func.func @transform_1(%arg0: i32) -> (i32, i32) {
    %c0_i32 = arith.constant 0 : i32
    %c0_i32_0 = arith.constant 0 : i32
    %c0_i32_1 = arith.constant 0 : i32
    return %c0_i32, %c0_i32_0 : i32, i32
  }
  func.func @transform_2(%arg0: i32) -> (i32, i32) {
    %c0_i32 = arith.constant 0 : i32
    %c0_i32_0 = arith.constant 0 : i32
    return %c0_i32, %arg0 : i32, i32
  }
  func.func @transform_3(%arg0: i32) -> (i32, i32) {
    %c0_i32 = arith.constant 0 : i32
    %c0_i32_0 = arith.constant 0 : i32
    return %c0_i32, %arg0 : i32, i32
  }
  func.func @transform_4(%arg0: i32) -> (i32, i32) {
    %c0_i32 = arith.constant 0 : i32
    %c0_i32_0 = arith.constant 0 : i32
    return %c0_i32, %arg0 : i32, i32
  }
}

</mosaic_0001>

<bundles_post_ra>
// kernel: tpu_custom_call.1
= control target key start
LH: loop header
LB: loop body
LE: loop exit
PB: predicated region body
PF: predicated region fallthrough
CT: control target
= control target key end

     0   :  { %9 = vsyncpa [#allocation3], 0  ;;  %s4438_s0 = inlined_call_operand.hbm [shape: f32[48,128], index: 0, kind: input, shape index: {}]   ;;  %s4439_s1 = inlined_call_operand.hbm [shape: f32[48,128], index: 1, kind: input, shape index: {}]   ;;  %s4440_s2 = inlined_call_operand.vmem [shape: s32[1,13], index: 2, kind: input, shape index: {}]   ;;  %s4441_s3 = inlined_call_operand.vmem [shape: s32[1,13], index: 3, kind: input, shape index: {}]   ;;  %s4442_s4 = inlined_call_operand.hbm [shape: f32[1,13], index: 4, kind: output, shape index: {}]  }
   0x1   :  { %10 = vsyncpa [#allocation6], 0 }
   0x2   :  { %11 = vsyncpa [#allocation4], 0  ;;  %s3336_s15 = smov [#allocation2]   ;;  %s3264_s19 = scalar_lea.hbm %s4438_s0, 768 }
   0x3   :  { %s17_s16 = sshll.u32 %s3336_s15, 4  ;;  %p3265_p0 = scmp.ne.s32.totalorder %s4438_s0, %s3264_s19  ;;  %s18_s16 = int_to_ptr.vmem [resolvable:$true] %s17_s16 }
   0x4   :  { %p3268_p1 = scmp.lt.u32.totalorder %s3264_s19, %s4438_s0 }
   0x6   :  { %p3270_p2 = pnand %p3268_p1, %p3265_p0 }
   0x8   :  { %3273 = shalt.err (!%p3270_p2)
}
   0x9   :  { %s3274_s24 = scalar_lea.vmem %s18_s16, 768  ;;  %p3279_p4 = scmp.lt.s32.totalorder %s18_s16, %s18_s16 }
   0xa   :  { %p3275_p3 = scmp.ne.s32.totalorder %s18_s16, %s3274_s24  ;;  %p3280_p5 = scmp.lt.s32.totalorder %s3274_s24, %s3274_s24 }
   0xc   :  { %p3281_p6 = por %p3280_p5, %p3279_p4 }
   0xe   :  { %p3282_p7 = pnand %p3281_p6, %p3275_p3 }
  0x10   :  { %3285 = shalt.err (!%p3282_p7)
}
  0x11   :  { %s3337_s25 = smov 128   ;;  %s3338_s26 = smov 8  }
  0x12   :  { %23 = dma.hbm_to_vmem [thread:$0]  %s4438_s0, 768, %s18_s16, [#allocation3], %s3337_s25, %s3337_s25, %s3338_s26  }
  0x13   :  { %s3339_s29 = smov [#allocation5]   ;;  %s3286_s7 = scalar_lea.hbm %s4439_s1, 768 }
  0x14   :  { %s29_s30 = sshll.u32 %s3339_s29, 4  ;;  %p3287_p8 = scmp.ne.s32.totalorder %s4439_s1, %s3286_s7  ;;  %s30_s30 = int_to_ptr.vmem [resolvable:$true] %s29_s30 }
  0x15   :  { %p3290_p9 = scmp.lt.u32.totalorder %s3286_s7, %s4439_s1 }
  0x17   :  { %p3292_p10 = pnand %p3290_p9, %p3287_p8 }
  0x19   :  { %3295 = shalt.err (!%p3292_p10)
}
  0x1a   :  { %s3296_s12 = scalar_lea.vmem %s30_s30, 768  ;;  %p3301_p12 = scmp.lt.s32.totalorder %s30_s30, %s30_s30 }
  0x1b   :  { %p3297_p11 = scmp.ne.s32.totalorder %s30_s30, %s3296_s12  ;;  %p3302_p13 = scmp.lt.s32.totalorder %s3296_s12, %s3296_s12 }
  0x1d   :  { %p3303_p0 = por %p3302_p13, %p3301_p12 }
  0x1f   :  { %p3304_p1 = pnand %p3303_p0, %p3297_p11 }
  0x21   :  { %3307 = shalt.err (!%p3304_p1)
}
  0x22   :  { %35 = dma.hbm_to_vmem [thread:$0]  %s4439_s1, 768, %s30_s30, [#allocation6], %s3337_s25, %s3337_s25, %s3338_s26  }
  0x23   :  { %3330 = dma.done.wait [#allocation3], 768  }
  0x24   :  { %3331 = vsyncadd [#allocation3], 4294966528 }
  0x25   :  { %3332 = dma.done.wait [#allocation6], 768  }
  0x26   :  { %3333 = vsyncadd [#allocation6], 4294966528  ;;  %v46_v0 = vlaneseq  ;;  %v3413_v14 = vld [vmem:[%s4440_s2] ss:$0 sm:$0xff]  ;;  %v3340_v18 = vmov 0.0   ;;  %v4545_v21 = vmov 0 }
  0x27   :  { %v3418_v15 = vld [vmem:[%s4441_s3] ss:$0 sm:$0xff]  ;;  %v4470_v24 = vmov 1.0|1.0   ;;  %v4548_v27 = vmov 0  ;;  %v4551_v33 = vmov 0 }
  0x28   :  { %v47_v1 = vshrl.u32 %v46_v0, 7  ;;  %v4554_v38 = vmov 0  ;;  %v4557_v43 = vmov 0  ;;  %v4560_v48 = vmov 0  ;;  %v3538_v51 = vld [vmem:[#allocation2] sm:$0xff]  ;;  %s3342_s2 = smov [#allocation7]  }
  0x29   :  { %v4563_v54 = vmov 0  ;;  %v4566_v59 = vmov 0  ;;  %v3576_v62 = vand.u32 4294901760, %v3538_v51  ;;  %s1917_s3 = sshll.u32 %s3342_s2, 4  ;;  %s1918_s3 = int_to_ptr.vmem [resolvable:$true] %s1917_s3 }
  0x2a   :  { %v48_v2 = vadd.s32 8, %v47_v1  ;;  %v49_v3 = vadd.s32 16, %v47_v1  ;;  %v50_v4 = vadd.s32 24, %v47_v1  ;;  %v3392_v5 = vadd.s32 32, %v47_v1  ;;  %s3308_s17 = scalar_lea.vmem %s1918_s3, 16  ;;  %s3312_s18 = scalar_lea.vmem %s1918_s3, 32 }
  0x2b   :  { %v3394_v6 = vadd.s32 40, %v47_v1  ;;  %v3396_v7 = vadd.s32 48, %v47_v1  ;;  %v3398_v8 = vadd.s32 56, %v47_v1  ;;  %v3400_v9 = vadd.s32 64, %v47_v1  ;;  %p3309_p2 = scmp.ne.s32.totalorder %s1918_s3, %s3308_s17  ;;  %p3313_p3 = scmp.lt.s32.totalorder %s1918_s3, %s1918_s3 }
  0x2c   :  { %v3402_v10 = vadd.s32 72, %v47_v1  ;;  %v3404_v11 = vadd.s32 80, %v47_v1  ;;  %v3406_v12 = vadd.s32 88, %v47_v1  ;;  %v3408_v13 = vadd.s32 96, %v47_v1  ;;  %p3314_p4 = scmp.lt.s32.totalorder %s3312_s18, %s3308_s17 }
  0x2d   :  { %v3420_v16 = vadd.s32 104, %v47_v1  ;;  %v3422_v17 = vadd.s32 112, %v47_v1  ;;  %vm68_vm0 = vcmp.eq.s32.totalorder %v47_v1, %v3413_v14  ;;  %vm69_vm1 = vcmp.eq.s32.totalorder %v48_v2, %v3413_v14 }
  0x2e   :  { %vm121_vm2 = vcmp.eq.s32.totalorder %v47_v1, %v3418_v15  ;;  %vm122_vm3 = vcmp.eq.s32.totalorder %v48_v2, %v3418_v15  ;;  %v1928_v19 = vsel %vm68_vm0, 1.0, %v3340_v18  ;;  %v1929_v20 = vsel %vm69_vm1, 1.0, %v3340_v18  ;;  %vm3430_vm4 = vmpackc.low %vm69_vm1, %vm68_vm0  ;;  %p3315_p5 = por %p3314_p4, %p3313_p3 }
  0x2f   :  { %v4546_v21 = vsel %vm3430_vm4, 4294967295, %v4545_v21  ;;  %v1945_v22 = vsel %vm121_vm2, 1.0, %v3340_v18  ;;  %v1946_v23 = vsel %vm122_vm3, 1.0, %v3340_v18  ;;  %2814 = vmatprep.subr.msk.bf16.mxu0 %vm3430_vm4, %v4470_v24  ;;  %v3439_v25 = vsub.f32 %v1928_v19, %v1928_v19  ;;  %vm3443_vm5 = vmpackc.low %vm122_vm3, %vm121_vm2 }
  0x30   :  { %4547 = vst [vmem:[#allocation11_spill] sm:$0xff] %v4546_v21  ;;  %v3441_v26 = vsub.f32 %v1929_v20, %v1929_v20  ;;  %v4549_v27 = vsel %vm3443_vm5, 4294967295, %v4548_v27  ;;  %v3447_v28 = vsub.f32 %v1945_v22, %v1945_v22  ;;  %v3449_v29 = vsub.f32 %v1946_v23, %v1946_v23  ;;  %3006 = vmatprep.subr.msk.bf16.mxu1 %vm3443_vm5, %v4470_v24  ;;  %p3316_p6 = pnand %p3315_p5, %p3309_p2 }
  0x31   :  { %4550 = vst [vmem:[#allocation12_spill] sm:$0xff] %v4549_v27  ;;  %2816 = vmatpush3.bf16.msk.msra.mxu0 %vm3430_vm4, %v4470_v24  ;;  %vm70_vm6 = vcmp.eq.s32.totalorder %v49_v3, %v3413_v14  ;;  %vm71_vm7 = vcmp.eq.s32.totalorder %v50_v4, %v3413_v14  ;;  %vm123_vm8 = vcmp.eq.s32.totalorder %v49_v3, %v3418_v15  ;;  %v3460_v30 = vadd.s32 120, %v47_v1 }
  0x32   :  { %3008 = vmatpush3.bf16.msk.msra.mxu1 %vm3443_vm5, %v4470_v24  ;;  %v1930_v31 = vsel %vm70_vm6, 1.0, %v3340_v18  ;;  %v1931_v32 = vsel %vm71_vm7, 1.0, %v3340_v18  ;;  %vm3467_vm9 = vmpackc.low %vm71_vm7, %vm70_vm6  ;;  %vm124_vm10 = vcmp.eq.s32.totalorder %v50_v4, %v3418_v15  ;;  %v1947_v34 = vsel %vm123_vm8, 1.0, %v3340_v18 }
  0x33   :  { %v4552_v33 = vsel %vm3467_vm9, 4294967295, %v4551_v33  ;;  %2818 = vmatprep.subr.msk.bf16.mxu0 %vm3467_vm9, %v4470_v24  ;;  %v3476_v35 = vsub.f32 %v1930_v31, %v1930_v31  ;;  %v3478_v36 = vsub.f32 %v1931_v32, %v1931_v32  ;;  %v1948_v37 = vsel %vm124_vm10, 1.0, %v3340_v18  ;;  %vm3481_vm11 = vmpackc.low %vm124_vm10, %vm123_vm8 }
  0x34   :  { %4553 = vst [vmem:[#allocation13_spill] sm:$0xff] %v4552_v33  ;;  %v4555_v38 = vsel %vm3481_vm11, 4294967295, %v4554_v38  ;;  %v3485_v39 = vsub.f32 %v1947_v34, %v1947_v34  ;;  %3010 = vmatprep.subr.msk.bf16.mxu1 %vm3481_vm11, %v4470_v24  ;;  %v3490_v40 = vsub.f32 %v1948_v37, %v1948_v37  ;;  %vm72_vm12 = vcmp.eq.s32.totalorder %v3392_v5, %v3413_v14 }
  0x35   :  { %4556 = vst [vmem:[#allocation14_spill] sm:$0xff] %v4555_v38  ;;  %vm73_vm13 = vcmp.eq.s32.totalorder %v3394_v6, %v3413_v14  ;;  %vm125_vm14 = vcmp.eq.s32.totalorder %v3392_v5, %v3418_v15  ;;  %2820 = vmatpush3.bf16.msk.msra.mxu0 %vm3467_vm9, %v4470_v24  ;;  %v1932_v41 = vsel %vm72_vm12, 1.0, %v3340_v18  ;;  %vm126_vm0 = vcmp.eq.s32.totalorder %v3394_v6, %v3418_v15 }
  0x36   :  { %v1933_v42 = vsel %vm73_vm13, 1.0, %v3340_v18  ;;  %vm3503_vm15 = vmpackc.low %vm73_vm13, %vm72_vm12  ;;  %v1949_v44 = vsel %vm125_vm14, 1.0, %v3340_v18  ;;  %3012 = vmatpush3.bf16.msk.msra.mxu1 %vm3481_vm11, %v4470_v24  ;;  %v3516_v45 = vsub.f32 %v1932_v41, %v1932_v41  ;;  %v1950_v47 = vsel %vm126_vm0, 1.0, %v3340_v18 }
  0x37   :  { %v4558_v43 = vsel %vm3503_vm15, 4294967295, %v4557_v43  ;;  %2822 = vmatprep.subr.msk.bf16.mxu0 %vm3503_vm15, %v4470_v24  ;;  %v3518_v46 = vsub.f32 %v1933_v42, %v1933_v42  ;;  %vm3521_vm1 = vmpackc.low %vm126_vm0, %vm125_vm14  ;;  %v3525_v49 = vsub.f32 %v1949_v44, %v1949_v44  ;;  %v3530_v50 = vsub.f32 %v1950_v47, %v1950_v47 }
  0x38   :  { %4559 = vst [vmem:[#allocation15_spill] sm:$0xff] %v4558_v43  ;;  %v4561_v48 = vsel %vm3521_vm1, 4294967295, %v4560_v48  ;;  %3014 = vmatprep.subr.msk.bf16.mxu1 %vm3521_vm1, %v4470_v24  ;;  %vm74_vm2 = vcmp.eq.s32.totalorder %v3396_v7, %v3413_v14  ;;  %vm75_vm3 = vcmp.eq.s32.totalorder %v3398_v8, %v3413_v14  ;;  %vm127_vm6 = vcmp.eq.s32.totalorder %v3396_v7, %v3418_v15 }
  0x39   :  { %4562 = vst [vmem:[#allocation16_spill] sm:$0xff] %v4561_v48  ;;  %v1934_v52 = vsel %vm74_vm2, 1.0, %v3340_v18  ;;  %v1935_v53 = vsel %vm75_vm3, 1.0, %v3340_v18  ;;  %vm3542_vm7 = vmpackc.low %vm75_vm3, %vm74_vm2  ;;  %vm128_vm8 = vcmp.eq.s32.totalorder %v3398_v8, %v3418_v15  ;;  %v1951_v55 = vsel %vm127_vm6, 1.0, %v3340_v18  ;;  %2824 = vmatpush3.bf16.msk.msra.mxu0 %vm3503_vm15, %v4470_v24 }
  0x3a   :  { %v4564_v54 = vsel %vm3542_vm7, 4294967295, %v4563_v54  ;;  %v3552_v56 = vsub.f32 %v1934_v52, %v1934_v52  ;;  %v3554_v57 = vsub.f32 %v1935_v53, %v1935_v53  ;;  %v1952_v58 = vsel %vm128_vm8, 1.0, %v3340_v18  ;;  %vm3557_vm10 = vmpackc.low %vm128_vm8, %vm127_vm6  ;;  %3016 = vmatpush3.bf16.msk.msra.mxu1 %vm3521_vm1, %v4470_v24  ;;  %2826 = vmatprep.subr.msk.bf16.mxu0 %vm3542_vm7, %v4470_v24 }
  0x3b   :  { %4565 = vst [vmem:[#allocation17_spill] sm:$0xff] %v4564_v54  ;;  %v4567_v59 = vsel %vm3557_vm10, 4294967295, %v4566_v59  ;;  %v3561_v60 = vsub.f32 %v1951_v55, %v1951_v55  ;;  %v3569_v61 = vsub.f32 %v1952_v58, %v1952_v58  ;;  %vm76_vm12 = vcmp.eq.s32.totalorder %v3400_v9, %v3413_v14  ;;  %3018 = vmatprep.subr.msk.bf16.mxu1 %vm3557_vm10, %v4470_v24 }
  0x3c   :  { %4568 = vst [vmem:[#allocation18_spill] sm:$0xff] %v4567_v59  ;;  %vm77_vm13 = vcmp.eq.s32.totalorder %v3402_v10, %v3413_v14  ;;  %v1936_v63 = vsel %vm76_vm12, 1.0, %v3340_v18  ;;  %v4569_v1 = vmov 0  ;;  %vm129_vm0 = vcmp.eq.s32.totalorder %v3400_v9, %v3418_v15 }
  0x3d   :  { %v1937_v0 = vsel %vm77_vm13, 1.0, %v3340_v18  ;;  %vm3583_vm14 = vmpackc.low %vm77_vm13, %vm76_vm12  ;;  %vm130_vm2 = vcmp.eq.s32.totalorder %v3402_v10, %v3418_v15  ;;  %v3591_v2 = vsub.f32 %v1936_v63, %v1936_v63  ;;  %v1953_v4 = vsel %vm129_vm0, 1.0, %v3340_v18  ;;  %2828 = vmatpush3.bf16.msk.msra.mxu0 %vm3542_vm7, %v4470_v24  ;;  %v1031_v63 = vld [vmem:[#allocation5] sm:$0xff] }
  0x3e   :  { %v4570_v1 = vsel %vm3583_vm14, 4294967295, %v4569_v1  ;;  %v3593_v3 = vsub.f32 %v1937_v0, %v1937_v0  ;;  %v1954_v5 = vsel %vm130_vm2, 1.0, %v3340_v18  ;;  %vm3597_vm3 = vmpackc.low %vm130_vm2, %vm129_vm0  ;;  %v4572_v6 = vmov 0  ;;  %3020 = vmatpush3.bf16.msk.msra.mxu1 %vm3557_vm10, %v4470_v24  ;;  %2830 = vmatprep.subr.msk.bf16.mxu0 %vm3583_vm14, %v4470_v24 }
  0x3f   :  { %4571 = vst [vmem:[#allocation19_spill] sm:$0xff] %v4570_v1  ;;  %v4573_v6 = vsel %vm3597_vm3, 4294967295, %v4572_v6  ;;  %v3604_v7 = vsub.f32 %v1953_v4, %v1953_v4  ;;  %v3606_v8 = vsub.f32 %v1954_v5, %v1954_v5  ;;  %vm78_vm6 = vcmp.eq.s32.totalorder %v3404_v11, %v3413_v14  ;;  %3022 = vmatprep.subr.msk.bf16.mxu1 %vm3597_vm3, %v4470_v24 }
  0x40   :  { %4574 = vst [vmem:[#allocation20_spill] sm:$0xff] %v4573_v6  ;;  %vm79_vm8 = vcmp.eq.s32.totalorder %v3406_v12, %v3413_v14  ;;  %v1938_v9 = vsel %vm78_vm6, 1.0, %v3340_v18  ;;  %vm131_vm12 = vcmp.eq.s32.totalorder %v3404_v11, %v3418_v15  ;;  %vm132_vm13 = vcmp.eq.s32.totalorder %v3406_v12, %v3418_v15 }
  0x41   :  { %v1939_v10 = vsel %vm79_vm8, 1.0, %v3340_v18  ;;  %vm3627_vm0 = vmpackc.low %vm79_vm8, %vm78_vm6  ;;  %v4575_v19 = vmov 0  ;;  %v3631_v20 = vsub.f32 %v1938_v9, %v1938_v9  ;;  %v1955_v23 = vsel %vm131_vm12, 1.0, %v3340_v18  ;;  %2832 = vmatpush3.bf16.msk.msra.mxu0 %vm3583_vm14, %v4470_v24 }
  0x42   :  { %v4576_v19 = vsel %vm3627_vm0, 4294967295, %v4575_v19  ;;  %v3633_v22 = vsub.f32 %v1939_v10, %v1939_v10  ;;  %v1956_v31 = vsel %vm132_vm13, 1.0, %v3340_v18  ;;  %vm3637_vm2 = vmpackc.low %vm132_vm13, %vm131_vm12  ;;  %v4578_v11 = vmov 0  ;;  %3024 = vmatpush3.bf16.msk.msra.mxu1 %vm3597_vm3, %v4470_v24  ;;  %2834 = vmatprep.subr.msk.bf16.mxu0 %vm3627_vm0, %v4470_v24  ;;  %v170_v10 = vld [vmem:[#allocation2 + $0x8] sm:$0xff] }
  0x43   :  { %4577 = vst [vmem:[#allocation21_spill] sm:$0xff] %v4576_v19  ;;  %v4579_v11 = vsel %vm3637_vm2, 4294967295, %v4578_v11  ;;  %v3641_v12 = vsub.f32 %v1955_v23, %v1955_v23  ;;  %v3643_v32 = vsub.f32 %v1956_v31, %v1956_v31  ;;  %vm80_vm6 = vcmp.eq.s32.totalorder %v3408_v13, %v3413_v14  ;;  %3026 = vmatprep.subr.msk.bf16.mxu1 %vm3637_vm2, %v4470_v24  ;;  %v1032_v23 = vld [vmem:[#allocation5 + $0x8] sm:$0xff] }
  0x44   :  { %4580 = vst [vmem:[#allocation22_spill] sm:$0xff] %v4579_v11  ;;  %vm81_vm8 = vcmp.eq.s32.totalorder %v3420_v16, %v3413_v14  ;;  %v1940_v34 = vsel %vm80_vm6, 1.0, %v3340_v18  ;;  %vm133_vm12 = vcmp.eq.s32.totalorder %v3408_v13, %v3418_v15  ;;  %vm134_vm13 = vcmp.eq.s32.totalorder %v3420_v16, %v3418_v15 }
  0x45   :  { %v1941_v37 = vsel %vm81_vm8, 1.0, %v3340_v18  ;;  %v3664_v41 = vsub.f32 %v1940_v34, %v1940_v34  ;;  %v1957_v44 = vsel %vm133_vm12, 1.0, %v3340_v18  ;;  %v1958_v47 = vsel %vm134_vm13, 1.0, %v3340_v18  ;;  %vm3673_vm14 = vmpackc.low %vm81_vm8, %vm80_vm6  ;;  %2836 = vmatpush3.bf16.msk.msra.mxu0 %vm3627_vm0, %v4470_v24 }
  0x46   :  { %v3666_v42 = vsub.f32 %v1941_v37, %v1941_v37  ;;  %v4581_v13 = vmov 0  ;;  %v3677_v16 = vsub.f32 %v1957_v44, %v1957_v44  ;;  %v3679_v52 = vsub.f32 %v1958_v47, %v1958_v47  ;;  %vm3685_vm7 = vmpackc.low %vm134_vm13, %vm133_vm12  ;;  %3028 = vmatpush3.bf16.msk.msra.mxu1 %vm3637_vm2, %v4470_v24  ;;  %2838 = vmatprep.subr.msk.bf16.mxu0 %vm3673_vm14, %v4470_v24 }
  0x47   :  { %v4582_v13 = vsel %vm3673_vm14, 4294967295, %v4581_v13  ;;  %vm82_vm3 = vcmp.eq.s32.totalorder %v3422_v17, %v3413_v14  ;;  %vm83_vm10 = vcmp.eq.s32.totalorder %v3460_v30, %v3413_v14  ;;  %v4584_v53 = vmov 0  ;;  %3030 = vmatprep.subr.msk.bf16.mxu1 %vm3685_vm7, %v4470_v24 }
  0x48   :  { %4583 = vst [vmem:[#allocation23_spill] sm:$0xff] %v4582_v13  ;;  %v4585_v53 = vsel %vm3685_vm7, 4294967295, %v4584_v53  ;;  %v1942_v55 = vsel %vm82_vm3, 1.0, %v3340_v18  ;;  %v1943_v58 = vsel %vm83_vm10, 1.0, %v3340_v18  ;;  %vm135_vm6 = vcmp.eq.s32.totalorder %v3422_v17, %v3418_v15  ;;  %vm3740_vm12 = vmpackc.low %vm83_vm10, %vm82_vm3 }
  0x49   :  { %4586 = vst [vmem:[#allocation24_spill] sm:$0xff] %v4585_v53  ;;  %vm136_vm8 = vcmp.eq.s32.totalorder %v3460_v30, %v3418_v15  ;;  %v3704_v0 = vsub.f32 %v1942_v55, %v1942_v55  ;;  %v3706_v4 = vsub.f32 %v1943_v58, %v1943_v58  ;;  %v1959_v5 = vsel %vm135_vm6, 1.0, %v3340_v18  ;;  %2840 = vmatpush3.bf16.msk.msra.mxu0 %vm3673_vm14, %v4470_v24 }
  0x4a   :  { %v1960_v9 = vsel %vm136_vm8, 1.0, %v3340_v18  ;;  %v3722_v31 = vsub.f32 %v1959_v5, %v1959_v5  ;;  %v3728_v37 = vsub.f32 %v3538_v51, %v3576_v62  ;;  %v4451_v18 = vand.u32 4294901760, %v3439_v25  ;;  %vm3755_vm13 = vmpackc.low %vm136_vm8, %vm135_vm6  ;;  %3032 = vmatpush3.bf16.msk.msra.mxu1 %vm3685_vm7, %v4470_v24  ;;  %2842 = vmatprep.subr.msk.bf16.mxu0 %vm3740_vm12, %v4470_v24 }
  0x4b   :  { %v3724_v34 = vsub.f32 %v1960_v9, %v1960_v9  ;;  %v4588_v44 = vmov 0  ;;  %v3745_v51 = vand.u32 4294901760, %v1031_v63  ;;  %v4591_v14 = vmov 0  ;;  %3034 = vmatprep.subr.msk.bf16.mxu1 %vm3755_vm13, %v4470_v24 }
  0x4c   :  { %4587 = vst [vmem:[#allocation25_spill] sm:$0xff] %v3728_v37  ;;  %v4589_v44 = vsel %vm3740_vm12, 4294967295, %v4588_v44  ;;  %v4592_v14 = vsel %vm3755_vm13, 4294967295, %v4591_v14  ;;  %v320_v9 = vsub.f32 %v3439_v25, %v4451_v18  ;;  %v3763_v47 = vand.u32 4294901760, %v170_v10 }
  0x4d   :  { %4590 = vst [vmem:[#allocation26_spill] sm:$0xff] %v4589_v44  ;;  %4593 = vst [vmem:[#allocation27_spill] sm:$0xff] %v4592_v14  ;;  %v3765_v55 = vand.u32 4294901760, %v1032_v23  ;;  %v4594_v15 = vand.u32 4294901760, %v3441_v26  ;;  %v3774_v30 = vsub.f32 %v1031_v63, %v3745_v51  ;;  %v4596_v5 = vand.u32 4294901760, %v3447_v28  ;;  %2844 = vmatpush3.bf16.msk.msra.mxu0 %vm3740_vm12, %v4470_v24 }
  0x4e   :  { %v4597_v18 = vand.u32 4294901760, %v3449_v29  ;;  %v321_v13 = vand.u32 4294901760, %v320_v9  ;;  %v3792_v19 = vsub.f32 %v170_v10, %v3763_v47  ;;  %v4473_v10 = vand.u32 4294901760, %v3476_v35  ;;  %3036 = vmatpush3.bf16.msk.msra.mxu1 %vm3755_vm13, %v4470_v24 }
  0x4f   :  { %v327_v17 = vsub.f32 %v3441_v26, %v4594_v15  ;;  %4595 = vst [vmem:[#allocation28_spill] sm:$0xff] %v3774_v30  ;;  %v1182_v58 = vsub.f32 %v3447_v28, %v4596_v5  ;;  %v4598_v15 = vand.u32 4294901760, %v3728_v37  ;;  %v3795_v5 = vsub.f32 %v1032_v23, %v3765_v55 }
  0x50   :  { %v1189_v11 = vsub.f32 %v3449_v29, %v4597_v18  ;;  %4599 = vst [vmem:[#allocation29_spill] sm:$0xff] %v3792_v19  ;;  %v4469_v53 = vand.u32 4294901760, %v3774_v30  ;;  %v4468_v54 = vand.u32 4294901760, %v3792_v19  ;;  %v4482_v44 = vand.u32 4294901760, %v3518_v46 }
  0x51   :  { %v259_v63 = vsub.f32 %v3728_v37, %v4598_v15  ;;  %4600 = vst [vmem:[#allocation30_spill] sm:$0xff] %v3795_v5  ;;  %v328_v18 = vand.u32 4294901760, %v327_v17  ;;  %v1183_v6 = vand.u32 4294901760, %v1182_v58  ;;  %v4472_v9 = vand.u32 4294901760, %v3795_v5 }
  0x52   :  { %v1190_v1 = vand.u32 4294901760, %v1189_v11  ;;  %v1121_v17 = vsub.f32 %v3774_v30, %v4469_v53  ;;  %v4476_v58 = vand.u32 4294901760, %v3478_v36  ;;  %v269_v11 = vsub.f32 %v3792_v19, %v4468_v54 }
  0x53   :  { %v260_v59 = vand.u32 4294901760, %v259_v63  ;;  %v2845_v23 = vpack.c.bf16 %v328_v18, %v321_v13  ;;  %v1131_v13 = vsub.f32 %v3795_v5, %v4472_v9  ;;  %v334_v63 = vsub.f32 %v3476_v35, %v4473_v10  ;;  %v173_v5 = vld [vmem:[#allocation2 + $0x20] sm:$0xff] }
  0x54   :  { %v3037_v15 = vpack.c.bf16 %v1190_v1, %v1183_v6  ;;  %v4479_v1 = vand.u32 4294901760, %v3485_v39  ;;  %v1122_v6 = vand.u32 4294901760, %v1121_v17  ;;  %v4480_v18 = vand.u32 4294901760, %v3490_v40 }
  0x55   :  { %2353 = vmatprep.mubr.f32.mxu0 %v260_v59  ;;  %2846 = vmatprep.subr.bf16.mxu0 %v2845_v23  ;;  %v341_v59 = vsub.f32 %v3478_v36, %v4476_v58  ;;  %v4481_v54 = vand.u32 4294901760, %v3516_v45  ;;  %v270_v53 = vand.u32 4294901760, %v269_v11  ;;  %v1132_v24 = vand.u32 4294901760, %v1131_v13 }
  0x56   :  { %3038 = vmatprep.subr.bf16.mxu1 %v3037_v15  ;;  %v335_v9 = vand.u32 4294901760, %v334_v63  ;;  %v1196_v10 = vsub.f32 %v3485_v39, %v4479_v1  ;;  %2599 = vmatprep.mubr.f32.mxu1 %v1122_v6  ;;  %v1203_v17 = vsub.f32 %v3490_v40, %v4480_v18  ;;  %v4483_v13 = vand.u32 4294901760, %v3525_v49 }
  0x57   :  { %v342_v14 = vand.u32 4294901760, %v341_v59  ;;  %v348_v58 = vsub.f32 %v3516_v45, %v4481_v54  ;;  %2354 = vmatmul.mubr.f32.vlgmr.msra.gmra.mrb[0].mxu0 %v270_v53  ;;  %2600 = vmatmul.mubr.f32.vlgmr.msra.gmra.mrb[0].mxu1 %v1132_v24  ;;  %v4484_v63 = vand.u32 4294901760, %v3530_v50  ;;  %v4487_v6 = vand.u32 4294901760, %v3552_v56 }
  0x58   :  { %v1197_v11 = vand.u32 4294901760, %v1196_v10  ;;  %2848 = vmatpush3.bf16.msra.mxu0 %v2845_v23  ;;  %3040 = vmatpush3.bf16.msra.mxu1 %v3037_v15  ;;  %v1204_v1 = vand.u32 4294901760, %v1203_v17  ;;  %v355_v54 = vsub.f32 %v3518_v46, %v4482_v44  ;;  %v1210_v24 = vsub.f32 %v3525_v49, %v4483_v13 }
  0x59   :  { %v2849_v59 = vpack.c.bf16 %v342_v14, %v335_v9  ;;  %v349_v18 = vand.u32 4294901760, %v348_v58  ;;  %v1217_v53 = vsub.f32 %v3530_v50, %v4484_v63  ;;  %v362_v10 = vsub.f32 %v3552_v56, %v4487_v6 }
  0x5a   :  { %v4493_v14 = vand.u32 4294901760, %v3554_v57  ;;  %v3041_v9 = vpack.c.bf16 %v1204_v1, %v1197_v11  ;;  %v356_v23 = vand.u32 4294901760, %v355_v54  ;;  %v4488_v15 = vand.u32 4294901760, %v3561_v60 }
  0x5b   :  { %2850 = vmatprep.subr.bf16.mxu0 %v2849_v59  ;;  %v4489_v58 = vand.u32 4294901760, %v3569_v61  ;;  %v1211_v17 = vand.u32 4294901760, %v1210_v24  ;;  %v1218_v44 = vand.u32 4294901760, %v1217_v53  ;;  %v363_v13 = vand.u32 4294901760, %v362_v10 }
  0x5c   :  { %v369_v63 = vsub.f32 %v3554_v57, %v4493_v14  ;;  %3042 = vmatprep.subr.bf16.mxu1 %v3041_v9  ;;  %2852 = vmatpush3.bf16.msra.mxu0 %v2849_v59  ;;  %v2853_v48 = vpack.c.bf16 %v356_v23, %v349_v18  ;;  %v1224_v6 = vsub.f32 %v3561_v60, %v4488_v15  ;;  %v4490_v1 = vand.u32 4294901760, %v3591_v2 }
  0x5d   :  { %v1231_v54 = vsub.f32 %v3569_v61, %v4489_v58  ;;  %3044 = vmatpush3.bf16.msra.mxu1 %v3041_v9  ;;  %v3045_v11 = vpack.c.bf16 %v1218_v44, %v1211_v17  ;;  %v4491_v53 = vand.u32 4294901760, %v3593_v3  ;;  %v4492_v10 = vand.u32 4294901760, %v3604_v7 }
  0x5e   :  { %v370_v24 = vand.u32 4294901760, %v369_v63  ;;  %2854 = vmatprep.subr.bf16.mxu0 %v2853_v48  ;;  %v1225_v59 = vand.u32 4294901760, %v1224_v6  ;;  %v376_v23 = vsub.f32 %v3591_v2, %v4490_v1  ;;  %v4494_v15 = vand.u32 4294901760, %v3606_v8  ;;  %v171_v6 = vld [vmem:[#allocation2 + $0x10] sm:$0xff] }
  0x5f   :  { %v1232_v18 = vand.u32 4294901760, %v1231_v54  ;;  %3046 = vmatprep.subr.bf16.mxu1 %v3045_v11  ;;  %v383_v44 = vsub.f32 %v3593_v3, %v4491_v53  ;;  %v1238_v63 = vsub.f32 %v3604_v7, %v4492_v10  ;;  %v4495_v9 = vand.u32 4294901760, %v3631_v20 }
  0x60   :  { %v2857_v58 = vpack.c.bf16 %v370_v24, %v363_v13  ;;  %2856 = vmatpush3.bf16.msra.mxu0 %v2853_v48  ;;  %v377_v54 = vand.u32 4294901760, %v376_v23  ;;  %v1245_v1 = vsub.f32 %v3606_v8, %v4494_v15  ;;  %v4498_v13 = vand.u32 4294901760, %v3633_v22 }
  0x61   :  { %v3049_v17 = vpack.c.bf16 %v1232_v18, %v1225_v59  ;;  %3048 = vmatpush3.bf16.msra.mxu1 %v3045_v11  ;;  %v384_v24 = vand.u32 4294901760, %v383_v44  ;;  %v1239_v53 = vand.u32 4294901760, %v1238_v63  ;;  %v390_v10 = vsub.f32 %v3631_v20, %v4495_v9  ;;  %v1033_v11 = vld [vmem:[#allocation5 + $0x10] sm:$0xff] }
  0x62   :  { %2858 = vmatprep.subr.bf16.mxu0 %v2857_v58  ;;  %v4501_v14 = vand.u32 4294901760, %v3641_v12  ;;  %v1246_v48 = vand.u32 4294901760, %v1245_v1  ;;  %v397_v59 = vsub.f32 %v3633_v22, %v4498_v13  ;;  %v4502_v18 = vand.u32 4294901760, %v3643_v32 }
  0x63   :  { %3050 = vmatprep.subr.bf16.mxu1 %v3049_v17  ;;  %v3892_v23 = vand.u32 4294901760, %v171_v6  ;;  %v2861_v15 = vpack.c.bf16 %v384_v24, %v377_v54  ;;  %v391_v44 = vand.u32 4294901760, %v390_v10  ;;  %v4503_v9 = vand.u32 4294901760, %v3664_v41 }
  0x64   :  { %v1252_v63 = vsub.f32 %v3641_v12, %v4501_v14  ;;  %2860 = vmatpush3.bf16.msra.mxu0 %v2857_v58  ;;  %v3053_v43 = vpack.c.bf16 %v1246_v48, %v1239_v53  ;;  %v398_v1 = vand.u32 4294901760, %v397_v59  ;;  %v1259_v13 = vsub.f32 %v3643_v32, %v4502_v18  ;;  %v172_v58 = vld [vmem:[#allocation2 + $0x18] sm:$0xff]  ;;  %v1034_v18 = vld [vmem:[#allocation5 + $0x18] sm:$0xff] }
  0x65   :  { %v3902_v38 = vsub.f32 %v171_v6, %v3892_v23  ;;  %3052 = vmatpush3.bf16.msra.mxu1 %v3049_v17  ;;  %2862 = vmatprep.subr.bf16.mxu0 %v2861_v15  ;;  %v404_v10 = vsub.f32 %v3664_v41, %v4503_v9  ;;  %v4511_v24 = vand.u32 4294901760, %v3666_v42  ;;  %v3908_v14 = vand.u32 4294901760, %v1033_v11 }
  0x66   :  { %v1253_v54 = vand.u32 4294901760, %v1252_v63  ;;  %3054 = vmatprep.subr.bf16.mxu1 %v3053_v43  ;;  %v2865_v53 = vpack.c.bf16 %v398_v1, %v391_v44  ;;  %v1260_v48 = vand.u32 4294901760, %v1259_v13  ;;  %v4512_v6 = vand.u32 4294901760, %v3677_v16 }
  0x67   :  { %4601 = vst [vmem:[#allocation31_spill] sm:$0xff] %v3902_v38  ;;  %v4510_v59 = vand.u32 4294901760, %v3902_v38  ;;  %v405_v17 = vand.u32 4294901760, %v404_v10  ;;  %v411_v63 = vsub.f32 %v3666_v42, %v4511_v24  ;;  %v3916_v9 = vsub.f32 %v1033_v11, %v3908_v14 }
  0x68   :  { %v4519_v33 = vand.u32 4294901760, %v3679_v52  ;;  %2864 = vmatpush3.bf16.msra.mxu0 %v2861_v15  ;;  %v3057_v19 = vpack.c.bf16 %v1260_v48, %v1253_v54  ;;  %v1266_v44 = vsub.f32 %v3677_v16, %v4512_v6  ;;  %v3925_v1 = vand.u32 4294901760, %v172_v58 }
  0x69   :  { %4602 = vst [vmem:[#allocation32_spill] sm:$0xff] %v3916_v9  ;;  %v279_v13 = vsub.f32 %v3902_v38, %v4510_v59  ;;  %3056 = vmatpush3.bf16.msra.mxu1 %v3053_v43  ;;  %2866 = vmatprep.subr.bf16.mxu0 %v2865_v53  ;;  %v412_v10 = vand.u32 4294901760, %v411_v63  ;;  %v4520_v11 = vand.u32 4294901760, %v3916_v9  ;;  %v3931_v54 = vand.u32 4294901760, %v1034_v18  ;;  %v1035_v38 = vld [vmem:[#allocation5 + $0x20] sm:$0xff] }
  0x6a   :  { %v1273_v15 = vsub.f32 %v3679_v52, %v4519_v33  ;;  %3058 = vmatprep.subr.bf16.mxu1 %v3057_v19  ;;  %v1267_v59 = vand.u32 4294901760, %v1266_v44  ;;  %v3934_v24 = vsub.f32 %v172_v58, %v3925_v1  ;;  %v3936_v6 = vand.u32 4294901760, %v173_v5 }
  0x6b   :  { %v280_v48 = vand.u32 4294901760, %v279_v13  ;;  %v2869_v43 = vpack.c.bf16 %v412_v10, %v405_v17  ;;  %v1141_v63 = vsub.f32 %v3916_v9, %v4520_v11  ;;  %v3942_v21 = vsub.f32 %v1034_v18, %v3931_v54 }
  0x6c   :  { %4603 = vst [vmem:[#allocation33_spill] sm:$0xff] %v3934_v24  ;;  %v1274_v27 = vand.u32 4294901760, %v1273_v15  ;;  %2868 = vmatpush3.bf16.msra.mxu0 %v2865_v53  ;;  %v4521_v13 = vand.u32 4294901760, %v3934_v24  ;;  %v3946_v44 = vsub.f32 %v173_v5, %v3936_v6  ;;  %v4522_v58 = vand.u32 4294901760, %v3704_v0  ;;  %v1036_v53 = vld [vmem:[#allocation5 + $0x28] sm:$0xff] }
  0x6d   :  { %4604 = vst [vmem:[#allocation34_spill] sm:$0xff] %v3942_v21  ;;  %2356 = vmatprep.mubr.f32.mxu0 %v280_v48  ;;  %v4525_v33 = vand.u32 4294901760, %v3706_v4  ;;  %3060 = vmatpush3.bf16.msra.mxu1 %v3057_v19  ;;  %v1142_v17 = vand.u32 4294901760, %v1141_v63  ;;  %v4530_v15 = vand.u32 4294901760, %v3942_v21  ;;  %v3951_v11 = vand.u32 4294901760, %v1035_v38 }
  0x6e   :  { %2870 = vmatprep.subr.bf16.mxu0 %v2869_v43  ;;  %v3061_v10 = vpack.c.bf16 %v1274_v27, %v1267_v59  ;;  %v289_v18 = vsub.f32 %v3934_v24, %v4521_v13  ;;  %v418_v5 = vsub.f32 %v3704_v0, %v4522_v58  ;;  %v4539_v48 = vand.u32 4294901760, %v3722_v31  ;;  %v174_v13 = vld [vmem:[#allocation2 + $0x28] sm:$0xff] }
  0x6f   :  { %v425_v19 = vsub.f32 %v3706_v4, %v4525_v33  ;;  %2602 = vmatprep.mubr.f32.mxu1 %v1142_v17  ;;  %v1151_v27 = vsub.f32 %v3942_v21, %v4530_v15  ;;  %v3967_v59 = vsub.f32 %v1035_v38, %v3951_v11  ;;  %v4538_v63 = vand.u32 4294901760, %v3724_v34 }
  0x70   :  { %3062 = vmatprep.subr.bf16.mxu1 %v3061_v10  ;;  %v290_v58 = vand.u32 4294901760, %v289_v18  ;;  %2872 = vmatpush3.bf16.msra.mxu0 %v2869_v43  ;;  %v4605_v24 = vand.u32 4294901760, %v3946_v44  ;;  %v419_v33 = vand.u32 4294901760, %v418_v5  ;;  %v1280_v38 = vsub.f32 %v3722_v31, %v4539_v48 }
  0x71   :  { %v426_v9 = vand.u32 4294901760, %v425_v19  ;;  %v1152_v30 = vand.u32 4294901760, %v1151_v27  ;;  %3064 = vmatpush3.bf16.msra.mxu1 %v3061_v10  ;;  %v4535_v15 = vand.u32 4294901760, %v3967_v59  ;;  %v1287_v21 = vsub.f32 %v3724_v34, %v4538_v63 }
  0x72   :  { %v299_v17 = vsub.f32 %v3946_v44, %v4605_v24  ;;  %2357 = vmatmul.mubr.f32.gmra.mrb[2].mxu0 %v290_v58  ;;  %v3981_v37 = vand.u32 4294901760, %v174_v13  ;;  %v3983_v24 = vand.u32 4294901760, %v1036_v53  ;;  %v1281_v5 = vand.u32 4294901760, %v1280_v38 }
  0x73   :  { %v2873_v18 = vpack.c.bf16 %v426_v9, %v419_v33  ;;  %2603 = vmatmul.mubr.f32.gmra.mrb[2].mxu1 %v1152_v30  ;;  %v1161_v10 = vsub.f32 %v3967_v59, %v4535_v15  ;;  %v1288_v19 = vand.u32 4294901760, %v1287_v21  ;;  %v2877_v27 = vpack.c.bf16 %v3441_v26, %v3439_v25 }
  0x74   :  { %v300_v43 = vand.u32 4294901760, %v299_v17  ;;  %v3991_v58 = vsub.f32 %v174_v13, %v3981_v37  ;;  %v3994_v33 = vsub.f32 %v1036_v53, %v3983_v24  ;;  %v3069_v30 = vpack.c.bf16 %v3449_v29, %v3447_v28 }
  0x75   :  { %2874 = vmatprep.subr.bf16.mxu0 %v2873_v18  ;;  %v1162_v9 = vand.u32 4294901760, %v1161_v10  ;;  %v3065_v17 = vpack.c.bf16 %v1288_v19, %v1281_v5  ;;  %v3073_v5 = vpack.c.bf16 %v3490_v40, %v3485_v39  ;;  %v4607_v19 = vand.u32 4294901760, %v3439_v25 }
  0x76   :  { %2359 = vmatprep.mubr.f32.mxu0 %v300_v43  ;;  %4606 = vst [vmem:[#allocation35_spill] sm:$0xff] %v3994_v33  ;;  %2876 = vmatpush3.bf16.msra.mxu0 %v2873_v18  ;;  %v4536_v38 = vand.u32 4294901760, %v3991_v58  ;;  %v4537_v21 = vand.u32 4294901760, %v3994_v33  ;;  %v2881_v43 = vpack.c.bf16 %v3478_v36, %v3476_v35  ;;  %v4611_v63 = vand.u32 4294901760, %v3476_v35 }
  0x77   :  { %2878 = vmatprep.subr.bf16.mxu0 %v2877_v27  ;;  %2605 = vmatprep.mubr.f32.mxu1 %v1162_v9  ;;  %v4608_v9 = vand.u32 4294901760, %v3441_v26  ;;  %v4613_v48 = vand.u32 4294901760, %v3485_v39  ;;  %v4614_v25 = vand.u32 4294901760, %v3490_v40  ;;  %v4615_v26 = vand.u32 4294901760, %v3516_v45 }
  0x78   :  { %3066 = vmatprep.subr.bf16.mxu1 %v3065_v17  ;;  %v309_v13 = vsub.f32 %v3991_v58, %v4536_v38  ;;  %v1171_v53 = vsub.f32 %v3994_v33, %v4537_v21  ;;  %v4609_v38 = vand.u32 4294901760, %v3447_v28  ;;  %v4610_v21 = vand.u32 4294901760, %v3449_v29 }
  0x79   :  { %3068 = vmatpush3.bf16.msra.mxu1 %v3065_v17  ;;  %v4014_v15 = vpack.c.bf16 %v4608_v9, %v4607_v19  ;;  %v4032_v33 = vpack.c.bf16 %v4614_v25, %v4613_v48  ;;  %v4616_v28 = vand.u32 4294901760, %v3518_v46  ;;  %v4617_v29 = vand.u32 4294901760, %v3525_v49 }
  0x7a   :  { %3070 = vmatprep.subr.bf16.mxu1 %v3069_v30  ;;  %v310_v18 = vand.u32 4294901760, %v309_v13  ;;  %v1172_v10 = vand.u32 4294901760, %v1171_v53  ;;  %v4020_v17 = vpack.c.bf16 %v4610_v21, %v4609_v38  ;;  %v4612_v13 = vand.u32 4294901760, %v3478_v36 }
  0x7b   :  { %v4038_v19 = vpack.c.bf16 %v4616_v28, %v4615_v26  ;;  %v4618_v35 = vand.u32 4294901760, %v3530_v50  ;;  %v4619_v39 = vand.u32 4294901760, %v3552_v56  ;;  %v4620_v40 = vand.u32 4294901760, %v3554_v57 }
  0x7c   :  { %v4026_v53 = vpack.c.bf16 %v4612_v13, %v4611_v63  ;;  %2360 = vmatmul.mubr.f32.gmra.mrb[4].mxu0 %v310_v18  ;;  %2606 = vmatmul.mubr.f32.gmra.mrb[4].mxu1 %v1172_v10  ;;  %v4621_v63 = vand.u32 4294901760, %v3561_v60  ;;  %v4622_v38 = vand.u32 4294901760, %v3569_v61  ;;  %v4623_v18 = vand.u32 4294901760, %v3591_v2 }
  0x7d   :  { %v4044_v36 = vpack.c.bf16 %v4618_v35, %v4617_v29  ;;  %v4050_v48 = vpack.c.bf16 %v4620_v40, %v4619_v39  ;;  %2394 = vmatprep.mubr.f32.mxu0 %v3576_v62  ;;  %2640 = vmatprep.mubr.f32.mxu1 %v3745_v51  ;;  %v4624_v10 = vand.u32 4294901760, %v3593_v3  ;;  %v4625_v13 = vand.u32 4294901760, %v3604_v7 }
  0x7e   :  { %v4056_v21 = vpack.c.bf16 %v4622_v38, %v4621_v63  ;;  %v4626_v25 = vand.u32 4294901760, %v3606_v8  ;;  %v4628_v28 = vand.u32 4294901760, %v3631_v20  ;;  %v4629_v29 = vand.u32 4294901760, %v3633_v22 }
  0x7f   :  { %v4064_v9 = vpack.c.bf16 %v4624_v10, %v4623_v18  ;;  %v4631_v39 = vand.u32 4294901760, %v3641_v12  ;;  %v4632_v40 = vand.u32 4294901760, %v3643_v32  ;;  %v4634_v38 = vand.u32 4294901760, %v3664_v41 }
  0x80   :  { %v4070_v26 = vpack.c.bf16 %v4626_v25, %v4625_v13  ;;  %v4076_v35 = vpack.c.bf16 %v4629_v29, %v4628_v28  ;;  %v4635_v18 = vand.u32 4294901760, %v3666_v42  ;;  %v4636_v13 = vand.u32 4294901760, %v3677_v16  ;;  %2395 = vmatmul.mubr.f32.vlgmr.msra.gmra.mrb[0].mxu0 %v3763_v47  ;;  %2641 = vmatmul.mubr.f32.vlgmr.msra.gmra.mrb[0].mxu1 %v3765_v55 }
  0x81   :  { %v4082_v63 = vpack.c.bf16 %v4632_v40, %v4631_v39  ;;  %v4637_v25 = vand.u32 4294901760, %v3679_v52  ;;  %v4638_v28 = vand.u32 4294901760, %v3704_v0  ;;  %v4639_v29 = vand.u32 4294901760, %v3706_v4  ;;  %2880 = vmatpush3.bf16.msra.mxu0 %v2877_v27  ;;  %3072 = vmatpush3.bf16.msra.mxu1 %v3069_v30  ;;  %v4657_v30 = vld [vmem:[#allocation35_spill] sm:$0xff] }
  0x82   :  { %4627 = vst [vmem:[#allocation36_spill] sm:$0xff] %v4070_v26  ;;  %4630 = vst [vmem:[#allocation37_spill] sm:$0xff] %v4076_v35  ;;  %v4088_v10 = vpack.c.bf16 %v4635_v18, %v4634_v38  ;;  %v4640_v39 = vand.u32 4294901760, %v3722_v31  ;;  %v4641_v40 = vand.u32 4294901760, %v3724_v34  ;;  %2882 = vmatprep.subr.bf16.mxu0 %v2881_v43  ;;  %3074 = vmatprep.subr.bf16.mxu1 %v3073_v5 }
  0x83   :  { %4633 = vst [vmem:[#allocation38_spill] sm:$0xff] %v4082_v63  ;;  %v4094_v26 = vpack.c.bf16 %v4637_v25, %v4636_v13  ;;  %v4100_v35 = vpack.c.bf16 %v4639_v29, %v4638_v28  ;;  %v2885_v38 = vpack.c.bf16 %v3518_v46, %v3516_v45  ;;  %v3077_v18 = vpack.c.bf16 %v3530_v50, %v3525_v49  ;;  %v4642_v50 = vld [vmem:[#allocation25_spill] sm:$0xff]  ;;  %v4664_v28 = vld [vmem:[#allocation19_spill] sm:$0xff]  ;;  %v4666_v29 = vld [vmem:[#allocation20_spill] sm:$0xff] }
  0x84   :  { %v4106_v63 = vpack.c.bf16 %v4641_v40, %v4640_v39  ;;  %2397 = vmatprep.mubr.f32.mxu0 %v3892_v23  ;;  %2643 = vmatprep.mubr.f32.mxu1 %v3908_v14  ;;  %v2889_v27 = vpack.c.bf16 %v3554_v57, %v3552_v56  ;;  %v3081_v45 = vpack.c.bf16 %v3569_v61, %v3561_v60  ;;  %v4643_v56 = vld [vmem:[#allocation28_spill] sm:$0xff]  ;;  %v4662_v13 = vand.u32 4294901760, %v4642_v50 }
  0x85   :  { %2398 = vmatmul.mubr.f32.gmra.mrb[2].mxu0 %v3925_v1  ;;  %2644 = vmatmul.mubr.f32.gmra.mrb[2].mxu1 %v3931_v54  ;;  %v2893_v46 = vpack.c.bf16 %v3593_v3, %v3591_v2  ;;  %v3085_v49 = vpack.c.bf16 %v3606_v8, %v3604_v7  ;;  %v2897_v57 = vpack.c.bf16 %v3633_v22, %v3631_v20  ;;  %v4644_v8 = vmov 1.0|1.0  }
  0x86   :  { %2884 = vmatpush3.bf16.msra.mxu0 %v2881_v43  ;;  %3076 = vmatpush3.bf16.msra.mxu1 %v3073_v5  ;;  %v3089_v60 = vpack.c.bf16 %v3643_v32, %v3641_v12  ;;  %v2901_v61 = vpack.c.bf16 %v3666_v42, %v3664_v41  ;;  %v3093_v2 = vpack.c.bf16 %v3679_v52, %v3677_v16  ;;  %v4647_v12 = vld [vmem:[#allocation29_spill] sm:$0xff]  ;;  %v4648_v32 = vld [vmem:[#allocation30_spill] sm:$0xff]  ;;  %v4651_v16 = vld [vmem:[#allocation31_spill] sm:$0xff]  ;;  %v4663_v25 = vand.u32 4294901760, %v4643_v56 }
  0x87   :  { %2886 = vmatprep.subr.bf16.mxu0 %v2885_v38  ;;  %3078 = vmatprep.subr.bf16.mxu1 %v3077_v18  ;;  %v2905_v3 = vpack.c.bf16 %v3706_v4, %v3704_v0  ;;  %v3097_v7 = vpack.c.bf16 %v3724_v34, %v3722_v31  ;;  %v4652_v52 = vld [vmem:[#allocation32_spill] sm:$0xff]  ;;  %v4653_v0 = vld [vmem:[#allocation33_spill] sm:$0xff]  ;;  %v4654_v4 = vld [vmem:[#allocation34_spill] sm:$0xff]  ;;  %vm4665_vm6 = vnez %v4664_v28  ;;  %vm4667_vm8 = vnez %v4666_v29 }
  0x88   :  { %2400 = vmatprep.mubr.f32.mxu0 %v3936_v6  ;;  %2646 = vmatprep.mubr.f32.mxu1 %v3951_v11  ;;  %v4658_v43 = vld [vmem:[#allocation17_spill] sm:$0xff]  ;;  %v4660_v5 = vld [vmem:[#allocation18_spill] sm:$0xff] }
  0x89   :  { %2401 = vmatmul.mubr.f32.gmra.mrb[4].mxu0 %v3981_v37  ;;  %2647 = vmatmul.mubr.f32.gmra.mrb[4].mxu1 %v3983_v24  ;;  %vm4659_vm10 = vnez %v4658_v43  ;;  %vm4661_vm3 = vnez %v4660_v5 }
  0x8a   :  { %2888 = vmatpush3.bf16.msra.mxu0 %v2885_v38  ;;  %3080 = vmatpush3.bf16.msra.mxu1 %v3077_v18 }
  0x8b   :  { %2890 = vmatprep.subr.bf16.mxu0 %v2889_v27  ;;  %3082 = vmatprep.subr.bf16.mxu1 %v3081_v45 }
  0x8c   :  { %2435 = vmatprep.mubr.f32.mxu0 %v4642_v50  ;;  %2681 = vmatprep.mubr.f32.mxu1 %v4643_v56  ;;  %v4676_v50 = vand.u32 4294901760, %v4651_v16  ;;  %v4677_v56 = vand.u32 4294901760, %v4652_v52 }
  0x8e   :  { %2892 = vmatpush3.bf16.msra.mxu0 %v2889_v27  ;;  %3084 = vmatpush3.bf16.msra.mxu1 %v3081_v45 }
  0x8f   :  { %2894 = vmatprep.subr.bf16.mxu0 %v2893_v46  ;;  %3086 = vmatprep.subr.bf16.mxu1 %v3085_v49 }
  0x92   :  { %2896 = vmatpush3.bf16.msra.mxu0 %v2893_v46  ;;  %3088 = vmatpush3.bf16.msra.mxu1 %v3085_v49  ;;  %v4674_v46 = vand.u32 4294901760, %v4647_v12  ;;  %v4675_v49 = vand.u32 4294901760, %v4648_v32 }
  0x93   :  { %2898 = vmatprep.subr.bf16.mxu0 %v2897_v57  ;;  %3090 = vmatprep.subr.bf16.mxu1 %v3089_v60 }
  0x96   :  { %2900 = vmatpush3.bf16.msra.mxu0 %v2897_v57  ;;  %3092 = vmatpush3.bf16.msra.mxu1 %v3089_v60  ;;  %v4678_v57 = vand.u32 4294901760, %v4653_v0  ;;  %v4679_v60 = vand.u32 4294901760, %v4654_v4 }
  0x97   :  { %2902 = vmatprep.subr.bf16.mxu0 %v2901_v61  ;;  %3094 = vmatprep.subr.bf16.mxu1 %v3093_v2 }
  0x9a   :  { %2904 = vmatpush3.bf16.msra.mxu0 %v2901_v61  ;;  %3096 = vmatpush3.bf16.msra.mxu1 %v3093_v2  ;;  %v4682_v61 = vand.u32 4294901760, %v3991_v58  ;;  %v4683_v2 = vand.u32 4294901760, %v4657_v30 }
  0x9b   :  { %2906 = vmatprep.subr.bf16.mxu0 %v2905_v3  ;;  %3098 = vmatprep.subr.bf16.mxu1 %v3097_v7 }
  0x9e   :  { %2908 = vmatpush3.bf16.msra.mxu0 %v2905_v3  ;;  %3100 = vmatpush3.bf16.msra.mxu1 %v3097_v7 }
  0x9f   :  { %2910 = vmatprep.subr.msk.bf16.mxu0 %vm3430_vm4, %v4644_v8  ;;  %3102 = vmatprep.subr.msk.bf16.mxu1 %vm3443_vm5, %v4644_v8 }
  0xa1   :  { %2436 = vmatmul.mubr.f32.vlgmr.msra.gmra.mrb[0].mxu0 %v4647_v12  ;;  %2682 = vmatmul.mubr.f32.vlgmr.msra.gmra.mrb[0].mxu1 %v4648_v32 }
  0xa2   :  { %2912 = vmatpush3.bf16.msk.msra.mxu0 %vm3430_vm4, %v4644_v8  ;;  %3104 = vmatpush3.bf16.msk.msra.mxu1 %vm3443_vm5, %v4644_v8 }
  0xa3   :  { %2914 = vmatprep.subr.msk.bf16.mxu0 %vm3467_vm9, %v4644_v8  ;;  %3106 = vmatprep.subr.msk.bf16.mxu1 %vm3481_vm11, %v4644_v8 }
  0xa4   :  { %2438 = vmatprep.mubr.f32.mxu0 %v4651_v16  ;;  %2684 = vmatprep.mubr.f32.mxu1 %v4652_v52 }
  0xa5   :  { %2439 = vmatmul.mubr.f32.gmra.mrb[2].mxu0 %v4653_v0  ;;  %2685 = vmatmul.mubr.f32.gmra.mrb[2].mxu1 %v4654_v4 }
  0xa6   :  { %2916 = vmatpush3.bf16.msk.msra.mxu0 %vm3467_vm9, %v4644_v8  ;;  %3108 = vmatpush3.bf16.msk.msra.mxu1 %vm3481_vm11, %v4644_v8 }
  0xa7   :  { %2918 = vmatprep.subr.msk.bf16.mxu0 %vm3503_vm15, %v4644_v8  ;;  %3110 = vmatprep.subr.msk.bf16.mxu1 %vm3521_vm1, %v4644_v8 }
  0xa8   :  { %2441 = vmatprep.mubr.f32.mxu0 %v3946_v44  ;;  %2687 = vmatprep.mubr.f32.mxu1 %v3967_v59 }
  0xa9   :  { %2442 = vmatmul.mubr.f32.gmra.mrb[4].mxu0 %v3991_v58  ;;  %2688 = vmatmul.mubr.f32.gmra.mrb[4].mxu1 %v4657_v30  ;;  %v4686_v58 = vld [vmem:[#allocation38_spill] sm:$0xff] }
  0xaa   :  { %2920 = vmatpush3.bf16.msk.msra.mxu0 %vm3503_vm15, %v4644_v8  ;;  %3112 = vmatpush3.bf16.msk.msra.mxu1 %vm3521_vm1, %v4644_v8 }
  0xab   :  { %2922 = vmatprep.subr.msk.bf16.mxu0 %vm4659_vm10, %v4644_v8  ;;  %3114 = vmatprep.subr.msk.bf16.mxu1 %vm4661_vm3, %v4644_v8 }
  0xac   :  { %2476 = vmatprep.mubr.f32.mxu0 %v4662_v13  ;;  %2722 = vmatprep.mubr.f32.mxu1 %v4663_v25 }
  0xae   :  { %2924 = vmatpush3.bf16.msk.msra.mxu0 %vm4659_vm10, %v4644_v8  ;;  %3116 = vmatpush3.bf16.msk.msra.mxu1 %vm4661_vm3, %v4644_v8 }
  0xaf   :  { %2926 = vmatprep.subr.msk.bf16.mxu0 %vm4665_vm6, %v4644_v8  ;;  %3118 = vmatprep.subr.msk.bf16.mxu1 %vm4667_vm8, %v4644_v8 }
  0xb2   :  { %2928 = vmatpush3.bf16.msk.msra.mxu0 %vm4665_vm6, %v4644_v8  ;;  %3120 = vmatpush3.bf16.msk.msra.mxu1 %vm4667_vm8, %v4644_v8 }
  0xb3   :  { %2930 = vmatprep.subr.msk.bf16.mxu0 %vm3627_vm0, %v4644_v8  ;;  %3122 = vmatprep.subr.msk.bf16.mxu1 %vm3637_vm2, %v4644_v8 }
  0xb6   :  { %2932 = vmatpush3.bf16.msk.msra.mxu0 %vm3627_vm0, %v4644_v8  ;;  %3124 = vmatpush3.bf16.msk.msra.mxu1 %vm3637_vm2, %v4644_v8 }
  0xb7   :  { %2934 = vmatprep.subr.msk.bf16.mxu0 %vm3673_vm14, %v4644_v8  ;;  %3126 = vmatprep.subr.msk.bf16.mxu1 %vm3685_vm7, %v4644_v8 }
  0xba   :  { %2936 = vmatpush3.bf16.msk.msra.mxu0 %vm3673_vm14, %v4644_v8  ;;  %3128 = vmatpush3.bf16.msk.msra.mxu1 %vm3685_vm7, %v4644_v8 }
  0xbb   :  { %2938 = vmatprep.subr.msk.bf16.mxu0 %vm3740_vm12, %v4644_v8  ;;  %3130 = vmatprep.subr.msk.bf16.mxu1 %vm3755_vm13, %v4644_v8 }
  0xbe   :  { %2940 = vmatpush3.bf16.msk.msra.mxu0 %vm3740_vm12, %v4644_v8  ;;  %3132 = vmatpush3.bf16.msk.msra.mxu1 %vm3755_vm13, %v4644_v8 }
  0xbf   :  { %2942 = vmatprep.subr.bf16.mxu0 %v4014_v15  ;;  %3134 = vmatprep.subr.bf16.mxu1 %v4020_v17 }
  0xc1   :  { %2477 = vmatmul.mubr.f32.vlgmr.msra.gmra.mrb[0].mxu0 %v4674_v46  ;;  %2723 = vmatmul.mubr.f32.vlgmr.msra.gmra.mrb[0].mxu1 %v4675_v49 }
  0xc2   :  { %2944 = vmatpush3.bf16.msra.mxu0 %v4014_v15  ;;  %3136 = vmatpush3.bf16.msra.mxu1 %v4020_v17  ;;  %v4680_v15 = vand.u32 4294901760, %v3946_v44  ;;  %v4681_v17 = vand.u32 4294901760, %v3967_v59  ;;  %v4684_v44 = vld [vmem:[#allocation36_spill] sm:$0xff]  ;;  %v4685_v59 = vld [vmem:[#allocation37_spill] sm:$0xff] }
  0xc3   :  { %2946 = vmatprep.subr.bf16.mxu0 %v4026_v53  ;;  %3138 = vmatprep.subr.bf16.mxu1 %v4032_v33 }
  0xc4   :  { %2479 = vmatprep.mubr.f32.mxu0 %v4676_v50  ;;  %2725 = vmatprep.mubr.f32.mxu1 %v4677_v56 }
  0xc5   :  { %2480 = vmatmul.mubr.f32.gmra.mrb[2].mxu0 %v4678_v57  ;;  %2726 = vmatmul.mubr.f32.gmra.mrb[2].mxu1 %v4679_v60 }
  0xc6   :  { %2948 = vmatpush3.bf16.msra.mxu0 %v4026_v53  ;;  %3140 = vmatpush3.bf16.msra.mxu1 %v4032_v33 }
  0xc7   :  { %2950 = vmatprep.subr.bf16.mxu0 %v4038_v19  ;;  %3142 = vmatprep.subr.bf16.mxu1 %v4044_v36 }
  0xc8   :  { %2482 = vmatprep.mubr.f32.mxu0 %v4680_v15  ;;  %2728 = vmatprep.mubr.f32.mxu1 %v4681_v17 }
  0xc9   :  { %2483 = vmatmul.mubr.f32.gmra.mrb[4].mxu0 %v4682_v61  ;;  %2729 = vmatmul.mubr.f32.gmra.mrb[4].mxu1 %v4683_v2 }
  0xca   :  { %2952 = vmatpush3.bf16.msra.mxu0 %v4038_v19  ;;  %3144 = vmatpush3.bf16.msra.mxu1 %v4044_v36 }
  0xcb   :  { %2954 = vmatprep.subr.bf16.mxu0 %v4050_v48  ;;  %3146 = vmatprep.subr.bf16.mxu1 %v4056_v21 }
  0xcc   :  { %2517 = vmatprep.mubr.f32.mxu0 %v3576_v62  ;;  %2763 = vmatprep.mubr.f32.mxu1 %v3745_v51 }
  0xce   :  { %2956 = vmatpush3.bf16.msra.mxu0 %v4050_v48  ;;  %3148 = vmatpush3.bf16.msra.mxu1 %v4056_v21 }
  0xcf   :  { %2958 = vmatprep.subr.bf16.mxu0 %v4064_v9  ;;  %3150 = vmatprep.subr.bf16.mxu1 %v4684_v44 }
  0xd2   :  { %2960 = vmatpush3.bf16.msra.mxu0 %v4064_v9  ;;  %3152 = vmatpush3.bf16.msra.mxu1 %v4684_v44 }
  0xd3   :  { %2962 = vmatprep.subr.bf16.mxu0 %v4685_v59  ;;  %3154 = vmatprep.subr.bf16.mxu1 %v4686_v58 }
  0xd6   :  { %2964 = vmatpush3.bf16.msra.mxu0 %v4685_v59  ;;  %3156 = vmatpush3.bf16.msra.mxu1 %v4686_v58 }
  0xd7   :  { %2966 = vmatprep.subr.bf16.mxu0 %v4088_v10  ;;  %3158 = vmatprep.subr.bf16.mxu1 %v4094_v26 }
  0xda   :  { %2968 = vmatpush3.bf16.msra.mxu0 %v4088_v10  ;;  %3160 = vmatpush3.bf16.msra.mxu1 %v4094_v26 }
  0xdb   :  { %2970 = vmatprep.subr.bf16.mxu0 %v4100_v35  ;;  %3162 = vmatprep.subr.bf16.mxu1 %v4106_v63 }
  0xde   :  { %2972 = vmatpush3.bf16.msra.mxu0 %v4100_v35  ;;  %3164 = vmatpush3.bf16.msra.mxu1 %v4106_v63 }
  0xdf   :  { %2974 = vmatprep.subr.msk.bf16.mxu0 %vm3430_vm4, %v4644_v8  ;;  %3166 = vmatprep.subr.msk.bf16.mxu1 %vm3443_vm5, %v4644_v8 }
  0xe1   :  { %2518 = vmatmul.mubr.f32.vlgmr.msra.gmra.mrb[0].mxu0 %v3763_v47  ;;  %2764 = vmatmul.mubr.f32.vlgmr.msra.gmra.mrb[0].mxu1 %v3765_v55 }
  0xe2   :  { %2976 = vmatpush3.bf16.msk.msra.mxu0 %vm3430_vm4, %v4644_v8  ;;  %3168 = vmatpush3.bf16.msk.msra.mxu1 %vm3443_vm5, %v4644_v8 }
  0xe3   :  { %2978 = vmatprep.subr.msk.bf16.mxu0 %vm3467_vm9, %v4644_v8  ;;  %3170 = vmatprep.subr.msk.bf16.mxu1 %vm3481_vm11, %v4644_v8 }
  0xe4   :  { %2520 = vmatprep.mubr.f32.mxu0 %v3892_v23  ;;  %2766 = vmatprep.mubr.f32.mxu1 %v3908_v14 }
  0xe5   :  { %2521 = vmatmul.mubr.f32.gmra.mrb[2].mxu0 %v3925_v1  ;;  %2767 = vmatmul.mubr.f32.gmra.mrb[2].mxu1 %v3931_v54 }
  0xe6   :  { %2980 = vmatpush3.bf16.msk.msra.mxu0 %vm3467_vm9, %v4644_v8  ;;  %3172 = vmatpush3.bf16.msk.msra.mxu1 %vm3481_vm11, %v4644_v8 }
  0xe7   :  { %2982 = vmatprep.subr.msk.bf16.mxu0 %vm3503_vm15, %v4644_v8  ;;  %3174 = vmatprep.subr.msk.bf16.mxu1 %vm3521_vm1, %v4644_v8 }
  0xe8   :  { %2523 = vmatprep.mubr.f32.mxu0 %v3936_v6  ;;  %2769 = vmatprep.mubr.f32.mxu1 %v3951_v11 }
  0xe9   :  { %2524 = vmatmul.mubr.f32.gmra.mrb[4].mxu0 %v3981_v37  ;;  %2770 = vmatmul.mubr.f32.gmra.mrb[4].mxu1 %v3983_v24 }
  0xea   :  { %2984 = vmatpush3.bf16.msk.msra.mxu0 %vm3503_vm15, %v4644_v8  ;;  %3176 = vmatpush3.bf16.msk.msra.mxu1 %vm3521_vm1, %v4644_v8 }
  0xeb   :  { %2986 = vmatprep.subr.msk.bf16.mxu0 %vm4659_vm10, %v4644_v8  ;;  %3178 = vmatprep.subr.msk.bf16.mxu1 %vm4661_vm3, %v4644_v8 }
  0xec   :  { %2558 = vmatprep.mubr.f32.mxu0 %v3576_v62  ;;  %2804 = vmatprep.mubr.f32.mxu1 %v3745_v51 }
  0xee   :  { %2988 = vmatpush3.bf16.msk.msra.mxu0 %vm4659_vm10, %v4644_v8  ;;  %3180 = vmatpush3.bf16.msk.msra.mxu1 %vm4661_vm3, %v4644_v8 }
  0xef   :  { %2990 = vmatprep.subr.msk.bf16.mxu0 %vm4665_vm6, %v4644_v8  ;;  %3182 = vmatprep.subr.msk.bf16.mxu1 %vm4667_vm8, %v4644_v8 }
  0xf2   :  { %2992 = vmatpush3.bf16.msk.msra.mxu0 %vm4665_vm6, %v4644_v8  ;;  %3184 = vmatpush3.bf16.msk.msra.mxu1 %vm4667_vm8, %v4644_v8 }
  0xf3   :  { %2994 = vmatprep.subr.msk.bf16.mxu0 %vm3627_vm0, %v4644_v8  ;;  %3186 = vmatprep.subr.msk.bf16.mxu1 %vm3637_vm2, %v4644_v8 }
  0xf6   :  { %2996 = vmatpush3.bf16.msk.msra.mxu0 %vm3627_vm0, %v4644_v8  ;;  %3188 = vmatpush3.bf16.msk.msra.mxu1 %vm3637_vm2, %v4644_v8 }
  0xf7   :  { %2998 = vmatprep.subr.msk.bf16.mxu0 %vm3673_vm14, %v4644_v8  ;;  %3190 = vmatprep.subr.msk.bf16.mxu1 %vm3685_vm7, %v4644_v8 }
  0xfa   :  { %3000 = vmatpush3.bf16.msk.msra.mxu0 %vm3673_vm14, %v4644_v8  ;;  %3192 = vmatpush3.bf16.msk.msra.mxu1 %vm3685_vm7, %v4644_v8 }
  0xfb   :  { %3002 = vmatprep.subr.msk.bf16.mxu0 %vm3740_vm12, %v4644_v8  ;;  %3194 = vmatprep.subr.msk.bf16.mxu1 %vm3755_vm13, %v4644_v8 }
  0xfe   :  { %3004 = vmatpush3.bf16.msk.msra.mxu0 %vm3740_vm12, %v4644_v8  ;;  %3196 = vmatpush3.bf16.msk.msra.mxu1 %vm3755_vm13, %v4644_v8 }
 0x101   :  { %2559 = vmatmul.mubr.f32.vlgmr.msra.gmra.mrb[0].mxu0 %v3763_v47  ;;  %2805 = vmatmul.mubr.f32.vlgmr.msra.gmra.mrb[0].mxu1 %v3765_v55 }
 0x102   :  { %2561 = vmatprep.mubr.f32.mxu0 %v3892_v23  ;;  %2807 = vmatprep.mubr.f32.mxu1 %v3908_v14 }
 0x105   :  { %2562 = vmatmul.mubr.f32.gmra.mrb[2].mxu0 %v3925_v1  ;;  %2808 = vmatmul.mubr.f32.gmra.mrb[2].mxu1 %v3931_v54 }
 0x106   :  { %2564 = vmatprep.mubr.f32.mxu0 %v3936_v6  ;;  %2810 = vmatprep.mubr.f32.mxu1 %v3951_v11 }
 0x109   :  { %2565 = vmatmul.mubr.f32.gmra.mrb[4].mxu0 %v3981_v37  ;;  %2811 = vmatmul.mubr.f32.gmra.mrb[4].mxu1 %v3983_v24 }
 0x1d4   :  { %v2560_v62 = vpop.f32.mrb[0].mxu0  ;;  %v2806_v47 = vpop.f32.mrb[0].mxu1 }
 0x1d5   :  { %v1894_v51 = vmul.f32 %v2806_v47, %v2560_v62  ;;  %v997_v55 = vpop.f32.mrb[1].mxu0  ;;  %v1859_v33 = vpop.f32.mrb[1].mxu1 }
 0x1d6   :  { %v1893_v23 = vmul.f32 %v1859_v33, %v997_v55 }
 0x1d8   :  { %v1899_v53 = vadd.f32 %v1894_v51, %v1893_v23  ;;  %v2563_v14 = vpop.f32.mrb[2].mxu0  ;;  %v2809_v19 = vpop.f32.mrb[2].mxu1 }
 0x1d9   :  { %v1896_v1 = vmul.f32 %v2809_v19, %v2563_v14  ;;  %v1009_v36 = vpop.f32.mrb[3].mxu0  ;;  %v1871_v54 = vpop.f32.mrb[3].mxu1 }
 0x1da   :  { %v1895_v48 = vmul.f32 %v1871_v54, %v1009_v36 }
 0x1dc   :  { %v1900_v6 = vadd.f32 %v1899_v53, %v1895_v48  ;;  %v2566_v21 = vpop.f32.mrb[4].mxu0  ;;  %v2812_v11 = vpop.f32.mrb[4].mxu1 }
 0x1dd   :  { %v1898_v9 = vmul.f32 %v2812_v11, %v2566_v21  ;;  %v1021_v37 = vpop.f32.mrb[5].mxu0  ;;  %v1883_v26 = vpop.f32.mrb[5].mxu1 }
 0x1de   :  { %v1897_v24 = vmul.f32 %v1883_v26, %v1021_v37  ;;  %v1901_v35 = vadd.f32 %v1900_v6, %v1896_v1 }
 0x1e0   :  { %v1902_v63 = vadd.f32 %v1901_v35, %v1897_v24 }
 0x1e2   :  { %v1903_v10 = vadd.f32 %v1902_v63, %v1898_v9 }
 0x1e4   :  { %v1904_v3 = vrot.slane %v1903_v10, 4 }
 0x1e6   :  { %v1905_v7 = vadd.f32 %v1904_v3, %v1903_v10 }
 0x1e8   :  { %v1906_v8 = vrot.slane %v1905_v7, 2 }
 0x1ea   :  { %v1907_v20 = vadd.f32 %v1906_v8, %v1905_v7 }
 0x1ec   :  { %v1908_v22 = vrot.slane %v1907_v20, 1 }
 0x1ee   :  { %v1909_v12 = vadd.f32 %v1908_v22, %v1907_v20 }
 0x1f0   :  { %1910 = vst [vmem:[#allocation7] sm:$0x1] %v1909_v12 }
 0x1f1   :  { %3319 = shalt.err (!%p3316_p6)
}
 0x1f2   :  { %s3320_s21 = scalar_lea.hbm %s4442_s4, 16 }
 0x1f3   :  { %p3321_p7 = scmp.ne.s32.totalorder %s4442_s4, %s3320_s21  ;;  %p3324_p8 = scmp.lt.u32.totalorder %s3320_s21, %s4442_s4 }
 0x1f5   :  { %p3326_p9 = pnand %p3324_p8, %p3321_p7 }
 0x1f7   :  { %3329 = shalt.err (!%p3326_p9)
}
 0x1f8   :  { %1920 = dma.vmem_to_hbm [thread:$0]  %s1918_s3, 16, %s4442_s4, [#allocation4]  }
 0x1f9   :  { %3334 = dma.done.wait [#allocation4], 16  }
 0x1fa   :  { %3335 = vsyncadd [#allocation4], 4294967280 }
 0x1fb   :  { %1924 = vsyncpa [#allocation3], 1 }
 0x1fc   :  { %1925 = vsyncpa [#allocation6], 1 }
 0x1fd   :  { %1926 = vsyncpa [#allocation4], 1 }

</bundles_post_ra>
